<compile_context>
chip_gen: v7x
topology: tpu7x:2x2x1
jax: 0.10.0
libtpu: 0.0.40
codegen_flags: <defaults>
</compile_context>

<pallas_src>
import functools

import jax
import jax.numpy as jnp
from jax.experimental import pallas as pl
from jax.experimental.pallas import tpu as pltpu


# --------------------------------------------------------------------------
# Kernel: the MLP part of EWDNN on one batch tile (feature-major layout).
# --------------------------------------------------------------------------
def ewdnn_mlp_kernel(x_ref, w0_ref, b0_ref, wh_ref, bh_ref, wo_ref, out_ref,
                     *, num_hidden):
    # x_ref:   (D_in, TB)   bf16  encoded input tile, batch on the lane axis
    # w0_ref:  (Hp, D_in)   bf16  dnn_0 weight (torch (out, in) layout)
    # b0_ref:  (Hp, 1)      f32   dnn_0 bias (column)
    # wh_ref:  (L', Hp, Hp) bf16  stacked hidden weights (L' = max(L, 1))
    # bh_ref:  (L', Hp, 1)  f32   stacked hidden biases
    # wo_ref:  (Op, Hp)     bf16  final_out weight (rows padded to x8, no bias)
    # out_ref: (Op, TB)     f32   lane-dense output slab
    f32 = jnp.float32
    bf16 = jnp.bfloat16

    # Layer 0: bf16 operands on the MXU, f32 accumulation; bias-add and tanh
    # in f32 (v5e has no bf16 VPU/EUP; on v6e/v7x the EUP slot is not binding).
    h = jnp.dot(w0_ref[...], x_ref[...], preferred_element_type=f32)
    h = jnp.tanh(h + b0_ref[...])                               # (Hp, TB) f32

    for i in range(num_hidden):                                 # static unroll
        z = jnp.dot(wh_ref[i], h.astype(bf16), preferred_element_type=f32)
        h = jnp.tanh(z + bh_ref[i])
        # TODO(synk): nn.Dropout is identity here (inference-mode forward);
        # training-mode stochastic masking is not implemented in-kernel.

    out = jnp.dot(wo_ref[...], h.astype(bf16), preferred_element_type=f32)
    out_ref[...] = out.astype(out_ref.dtype)                    # full unmasked vst


# --------------------------------------------------------------------------
# Wrapper: feature encoding (glue) + tiled pallas_call for the MLP.
# --------------------------------------------------------------------------
def encode_features_t(X_raw, vocab_sizes, dtype=jnp.bfloat16):
    """Feature-embedding glue, feature-major: rows = [numeric | one-hot cat],
    columns = batch.  Built directly transposed so the kernel's batch dim is
    the 128-wide lane axis with no extra HBM transpose."""
    num_rows, cat_rows = [], []
    for i, v in enumerate(vocab_sizes):
        col = X_raw[:, i]
        if v == 1:
            num_rows.append(col.astype(dtype)[None, :])                  # (1, B)
        else:
            cat_rows.append(
                jax.nn.one_hot(col.astype(jnp.int32), v, axis=0, dtype=dtype))
    return jnp.concatenate(num_rows + cat_rows, axis=0)                  # (D_in, B)


def _round_up(x, m):
    return ((x + m - 1) // m) * m


def _pick_tb(batch, bytes_per_row):
    """Batch tile: multiple of 128 (lane-dense), sized so the x stream per grid
    step is ~1 MiB (per-step overhead << DMA+compute), while keeping >= 2 grid
    steps at production batch sizes (v7x megacore + DMA/compute overlap)."""
    b128 = _round_up(batch, 128)
    if b128 <= 512:
        return b128                                   # tiny batch: one padded tile
    target = (1024 * 1024) // max(bytes_per_row, 1)   # ~1 MiB of x per step
    tb = max(512, min(32768, (target // 128) * 128))
    tb = min(tb, max(128, (b128 // 2 // 128) * 128))  # keep >= 2 grid steps
    return tb


def ewdnn_forward(X_raw, vocab_sizes, w0, b0, wh, bh, wo, *, tb=None):
    """EWDNN forward.

    Torch-layout parameters:
      w0: (H, D_in)  dnn_0.weight        b0: (H,)    dnn_0.bias
      wh: (L, H, H)  dnn_i.weight stack  bh: (L, H)  dnn_i.bias stack (L may be 0)
      wo: (O, H)     final_out.weight (no bias)
    Returns (B,) when O == 1 (matching torch's .squeeze()), else (B, O).
    """
    bf16, f32 = jnp.bfloat16, jnp.float32
    x_t = encode_features_t(X_raw, vocab_sizes, dtype=bf16)       # (D_in, B)
    D_in, B = x_t.shape
    H = w0.shape[0]
    O = wo.shape[0]
    L = 0 if (wh is None or wh.size == 0) else wh.shape[0]
    assert w0.shape == (H, D_in) and wo.shape == (O, H)

    # Pad hidden/output widths to sublane multiples only (batch is the lane
    # axis, so no 128-padding of H is needed for lane density).  Padded
    # channels stay exactly zero through every layer since tanh(0) == 0.
    # D_in is NOT padded: that would inflate the dominant x DMA stream.
    Hp = _round_up(H, 8)
    Op = _round_up(O, 8)
    L_eff = max(L, 1)

    # Hoisted one-time weight prep (casts out of the per-grid-step path).
    w0_p = jnp.zeros((Hp, D_in), bf16).at[:H, :].set(w0.astype(bf16))
    b0_p = jnp.zeros((Hp, 1), f32).at[:H, 0].set(b0.astype(f32))
    wh_p = jnp.zeros((L_eff, Hp, Hp), bf16)
    bh_p = jnp.zeros((L_eff, Hp, 1), f32)
    if L > 0:
        wh_p = wh_p.at[:L, :H, :H].set(wh.astype(bf16))
        bh_p = bh_p.at[:L, :H, 0].set(bh.astype(f32))
    wo_p = jnp.zeros((Op, Hp), bf16).at[:O, :H].set(wo.astype(bf16))

    if tb is None:
        tb = _pick_tb(B, D_in * x_t.dtype.itemsize)
    B_pad = pl.cdiv(B, tb) * tb
    if B_pad != B:
        # Padded batch columns produce tanh(b) values but are sliced off below.
        x_t = jnp.pad(x_t, ((0, 0), (0, B_pad - B)))
    grid = (B_pad // tb,)

    kernel = functools.partial(ewdnn_mlp_kernel, num_hidden=L)

    out_slab = pl.pallas_call(
        kernel,
        out_shape=jax.ShapeDtypeStruct((Op, B_pad), f32),
        grid_spec=pltpu.PrefetchScalarGridSpec(
            num_scalar_prefetch=0,
            grid=grid,
            in_specs=[
                pl.BlockSpec((D_in, tb), lambda i: (0, i)),          # x (pipelined)
                pl.BlockSpec((Hp, D_in), lambda i: (0, 0)),          # W0 (resident)
                pl.BlockSpec((Hp, 1), lambda i: (0, 0)),             # b0
                pl.BlockSpec((L_eff, Hp, Hp), lambda i: (0, 0, 0)),  # hidden weights
                pl.BlockSpec((L_eff, Hp, 1), lambda i: (0, 0, 0)),   # hidden biases
                pl.BlockSpec((Op, Hp), lambda i: (0, 0)),            # final weight
            ],
            out_specs=pl.BlockSpec((Op, tb), lambda i: (0, i)),      # lane-dense slab
        ),
        compiler_params=pltpu.CompilerParams(
            dimension_semantics=("parallel",),
            vmem_limit_bytes=40 * 1024 * 1024,   # actual footprint <= ~8 MiB
        ),
    )(x_t, w0_p, b0_p, wh_p, bh_p, wo_p)

    out = out_slab[:O, :B].T                      # (B, O); drops all padding
    return out[:, 0] if O == 1 else out


# --------------------------------------------------------------------------
# Pure-JAX f32 reference mirroring the torch forward (dropout = identity).
# --------------------------------------------------------------------------
def ewdnn_ref(X_raw, vocab_sizes, w0, b0, wh, bh, wo):
    num_cols, cat_cols = [], []
    for i, v in enumerate(vocab_sizes):
        if v == 1:
            num_cols.append(X_raw[:, i:i + 1].astype(jnp.float32))
        else:
            cat_cols.append(
                jax.nn.one_hot(X_raw[:, i].astype(jnp.int32), v, dtype=jnp.float32))
    x = jnp.concatenate(num_cols + cat_cols, axis=1)              # (B, D_in)
    h = jnp.tanh(x @ w0.T + b0)
    for i in range(0 if wh is None else wh.shape[0]):
        h = jnp.tanh(h @ wh[i].T + bh[i])
    out = h @ wo.T
    return out[:, 0] if out.shape[-1] == 1 else out


if __name__ == "__main__":
    key = jax.random.PRNGKey(0)
    k_fields, kw0, kb0, kwh, kbh, kwo = jax.random.split(key, 6)

    # Small shapes consistent with the module.
    B = 8
    vocab_sizes = (1, 6, 1, 9, 4)       # two numeric fields, three categorical
    hidden_dims = 32
    hidden_nums = 3                     # dnn_0 + 2 extra hidden layers
    num_outputs = 1
    L = hidden_nums - 1
    D_in = sum(vocab_sizes)             # deep_input_dim = 21

    # Raw input (B, F): numeric columns are floats, categorical are codes.
    sub = jax.random.split(k_fields, len(vocab_sizes))
    cols = []
    for i, v in enumerate(vocab_sizes):
        if v == 1:
            cols.append(jax.random.normal(sub[i], (B, 1), dtype=jnp.float32))
        else:
            cols.append(jax.random.randint(sub[i], (B, 1), 0, v).astype(jnp.float32))
    X_raw = jnp.concatenate(cols, axis=1)

    # Torch-layout (out, in) parameters, xavier-ish scales (exact torch init
    # is irrelevant for checking the kernel against the reference).
    w0 = jax.random.normal(kw0, (hidden_dims, D_in), jnp.float32) * (
        2.0 / (D_in + hidden_dims)) ** 0.5
    b0 = 0.1 * jax.random.normal(kb0, (hidden_dims,), jnp.float32)
    wh = jax.random.normal(kwh, (L, hidden_dims, hidden_dims), jnp.float32) * (
        1.0 / hidden_dims) ** 0.5
    bh = 0.1 * jax.random.normal(kbh, (L, hidden_dims), jnp.float32)
    wo = jax.random.normal(kwo, (num_outputs, hidden_dims), jnp.float32) * (
        2.0 / (hidden_dims + num_outputs)) ** 0.5

    out = ewdnn_forward(X_raw, vocab_sizes, w0, b0, wh, bh, wo)
    out = jax.block_until_ready(out)

    ref = ewdnn_ref(X_raw, vocab_sizes, w0, b0, wh, bh, wo)
    assert out.shape == (B,)
    # bf16 inputs/weights on the MXU (f32 accumulate, f32 tanh) vs f32 ref.
    assert jnp.allclose(out, ref, rtol=3e-2, atol=3e-2), (out, ref)
    print("KERNEL_OK")
</pallas_src>

<mosaic_0001>
module attributes {stable_mosaic.version = 11 : i64} {
  func.func @ewdnn_mlp_kernel(%arg0: i32, %arg1: memref<21x128xbf16, #tpu.memory_space<vmem>>, %arg2: memref<32x21xbf16, #tpu.memory_space<vmem>>, %arg3: memref<32x1xf32, #tpu.memory_space<vmem>>, %arg4: memref<2x32x32xbf16, #tpu.memory_space<vmem>>, %arg5: memref<2x32x1xf32, #tpu.memory_space<vmem>>, %arg6: memref<8x32xbf16, #tpu.memory_space<vmem>>, %arg7: memref<8x128xf32, #tpu.memory_space<vmem>>) attributes {dimension_semantics = [#tpu.dimension_semantics<parallel>], iteration_bounds = array<i64: 1>, scalar_prefetch = 0 : i64, scratch_operands = 0 : i64, tpu.core_type = #tpu.core_type<tc>, window_params = [{transform_indices = @transform_0, window_bounds = array<i64: 21, 128>}, {pipeline_mode = #tpu.pipeline_mode<synchronous>, transform_indices = @transform_1, window_bounds = array<i64: 32, 21>}, {pipeline_mode = #tpu.pipeline_mode<synchronous>, transform_indices = @transform_2, window_bounds = array<i64: 32, 1>}, {pipeline_mode = #tpu.pipeline_mode<synchronous>, transform_indices = @transform_3, window_bounds = array<i64: 2, 32, 32>}, {pipeline_mode = #tpu.pipeline_mode<synchronous>, transform_indices = @transform_4, window_bounds = array<i64: 2, 32, 1>}, {pipeline_mode = #tpu.pipeline_mode<synchronous>, transform_indices = @transform_5, window_bounds = array<i64: 8, 32>}, {transform_indices = @transform_6, window_bounds = array<i64: 8, 128>}]} {
    %c0 = arith.constant 0 : index
    %c0_0 = arith.constant 0 : index
    %0 = vector.load %arg2[%c0, %c0_0] : memref<32x21xbf16, #tpu.memory_space<vmem>>, vector<32x21xbf16>
    %c0_1 = arith.constant 0 : index
    %c0_2 = arith.constant 0 : index
    %1 = vector.load %arg1[%c0_1, %c0_2] : memref<21x128xbf16, #tpu.memory_space<vmem>>, vector<21x128xbf16>
    %cst = arith.constant dense<0.000000e+00> : vector<32x128xf32>
    %2 = tpu.matmul %0, %1, %cst {dimension_numbers = #tpu.dot_dimension_numbers<[1], [0], [0], [1], [0, 0, 1, 1], [], []>} : vector<32x21xbf16>, vector<21x128xbf16>, vector<32x128xf32> -> vector<32x128xf32>
    %c0_3 = arith.constant 0 : index
    %c0_4 = arith.constant 0 : index
    %3 = vector.load %arg3[%c0_3, %c0_4] : memref<32x1xf32, #tpu.memory_space<vmem>>, vector<32x1xf32>
    %4 = vector.broadcast %3 : vector<32x1xf32> to vector<32x128xf32>
    %5 = arith.addf %2, %4 : vector<32x128xf32>
    %6 = math.tanh %5 : vector<32x128xf32>
    %c0_5 = arith.constant 0 : index
    %c0_6 = arith.constant 0 : index
    %c0_7 = arith.constant 0 : index
    %7 = vector.load %arg4[%c0_5, %c0_6, %c0_7] : memref<2x32x32xbf16, #tpu.memory_space<vmem>>, vector<1x32x32xbf16>
    %8 = vector.shape_cast %7 : vector<1x32x32xbf16> to vector<32x32xbf16>
    %9 = arith.truncf %6 : vector<32x128xf32> to vector<32x128xbf16>
    %cst_8 = arith.constant dense<0.000000e+00> : vector<32x128xf32>
    %10 = tpu.matmul %8, %9, %cst_8 {dimension_numbers = #tpu.dot_dimension_numbers<[1], [0], [0], [1], [0, 0, 1, 1], [], []>} : vector<32x32xbf16>, vector<32x128xbf16>, vector<32x128xf32> -> vector<32x128xf32>
    %c0_9 = arith.constant 0 : index
    %c0_10 = arith.constant 0 : index
    %c0_11 = arith.constant 0 : index
    %11 = vector.load %arg5[%c0_9, %c0_10, %c0_11] : memref<2x32x1xf32, #tpu.memory_space<vmem>>, vector<1x32x1xf32>
    %12 = vector.shape_cast %11 : vector<1x32x1xf32> to vector<32x1xf32>
    %13 = vector.broadcast %12 : vector<32x1xf32> to vector<32x128xf32>
    %14 = arith.addf %10, %13 : vector<32x128xf32>
    %15 = math.tanh %14 : vector<32x128xf32>
    %c1 = arith.constant 1 : index
    %c0_12 = arith.constant 0 : index
    %c0_13 = arith.constant 0 : index
    %16 = vector.load %arg4[%c1, %c0_12, %c0_13] : memref<2x32x32xbf16, #tpu.memory_space<vmem>>, vector<1x32x32xbf16>
    %17 = vector.shape_cast %16 : vector<1x32x32xbf16> to vector<32x32xbf16>
    %18 = arith.truncf %15 : vector<32x128xf32> to vector<32x128xbf16>
    %cst_14 = arith.constant dense<0.000000e+00> : vector<32x128xf32>
    %19 = tpu.matmul %17, %18, %cst_14 {dimension_numbers = #tpu.dot_dimension_numbers<[1], [0], [0], [1], [0, 0, 1, 1], [], []>} : vector<32x32xbf16>, vector<32x128xbf16>, vector<32x128xf32> -> vector<32x128xf32>
    %c1_15 = arith.constant 1 : index
    %c0_16 = arith.constant 0 : index
    %c0_17 = arith.constant 0 : index
    %20 = vector.load %arg5[%c1_15, %c0_16, %c0_17] : memref<2x32x1xf32, #tpu.memory_space<vmem>>, vector<1x32x1xf32>
    %21 = vector.shape_cast %20 : vector<1x32x1xf32> to vector<32x1xf32>
    %22 = vector.broadcast %21 : vector<32x1xf32> to vector<32x128xf32>
    %23 = arith.addf %19, %22 : vector<32x128xf32>
    %24 = math.tanh %23 : vector<32x128xf32>
    %c0_18 = arith.constant 0 : index
    %c0_19 = arith.constant 0 : index
    %25 = vector.load %arg6[%c0_18, %c0_19] : memref<8x32xbf16, #tpu.memory_space<vmem>>, vector<8x32xbf16>
    %26 = arith.truncf %24 : vector<32x128xf32> to vector<32x128xbf16>
    %cst_20 = arith.constant dense<0.000000e+00> : vector<8x128xf32>
    %27 = tpu.matmul %25, %26, %cst_20 {dimension_numbers = #tpu.dot_dimension_numbers<[1], [0], [0], [1], [0, 0, 1, 1], [], []>} : vector<8x32xbf16>, vector<32x128xbf16>, vector<8x128xf32> -> vector<8x128xf32>
    %c0_21 = arith.constant 0 : index
    %c0_22 = arith.constant 0 : index
    %28 = vector.load %arg7[%c0_21, %c0_22] : memref<8x128xf32, #tpu.memory_space<vmem>>, vector<8x128xf32>
    tpu.vector_store %arg7[%c0_21, %c0_22], %27 {strides = array<i32>} : memref<8x128xf32, #tpu.memory_space<vmem>>, vector<8x128xf32>,
    return
  }
  func.func @transform_0(%arg0: i32) -> (i32, i32) {
    %c0_i32 = arith.constant 0 : i32
    %c0_i32_0 = arith.constant 0 : i32
    return %c0_i32, %arg0 : i32, i32
  }
  func.func @transform_1(%arg0: i32) -> (i32, i32) {
    %c0_i32 = arith.constant 0 : i32
    %c0_i32_0 = arith.constant 0 : i32
    %c0_i32_1 = arith.constant 0 : i32
    return %c0_i32, %c0_i32_0 : i32, i32
  }
  func.func @transform_2(%arg0: i32) -> (i32, i32) {
    %c0_i32 = arith.constant 0 : i32
    %c0_i32_0 = arith.constant 0 : i32
    %c0_i32_1 = arith.constant 0 : i32
    return %c0_i32, %c0_i32_0 : i32, i32
  }
  func.func @transform_3(%arg0: i32) -> (i32, i32, i32) {
    %c0_i32 = arith.constant 0 : i32
    %c0_i32_0 = arith.constant 0 : i32
    %c0_i32_1 = arith.constant 0 : i32
    %c0_i32_2 = arith.constant 0 : i32
    return %c0_i32, %c0_i32_0, %c0_i32_1 : i32, i32, i32
  }
  func.func @transform_4(%arg0: i32) -> (i32, i32, i32) {
    %c0_i32 = arith.constant 0 : i32
    %c0_i32_0 = arith.constant 0 : i32
    %c0_i32_1 = arith.constant 0 : i32
    %c0_i32_2 = arith.constant 0 : i32
    return %c0_i32, %c0_i32_0, %c0_i32_1 : i32, i32, i32
  }
  func.func @transform_5(%arg0: i32) -> (i32, i32) {
    %c0_i32 = arith.constant 0 : i32
    %c0_i32_0 = arith.constant 0 : i32
    %c0_i32_1 = arith.constant 0 : i32
    return %c0_i32, %c0_i32_0 : i32, i32
  }
  func.func @transform_6(%arg0: i32) -> (i32, i32) {
    %c0_i32 = arith.constant 0 : i32
    %c0_i32_0 = arith.constant 0 : i32
    return %c0_i32, %arg0 : i32, i32
  }
}

</mosaic_0001>

<bundles_post_ra>
// kernel: tpu_custom_call.1
= control target key start
LH: loop header
LB: loop body
LE: loop exit
PB: predicated region body
PF: predicated region fallthrough
CT: control target
= control target key end

     0   :  { %vm82_vm0 = vcmask 1041408   ;;  %vm83_vm1 = vcmask 1042432   ;;  %v537_v3 = vmov 65535   ;;  %vm75_vm2 = vcmask 171008   ;;  %s659_s0 = inlined_call_operand.vmem [shape: bf16[21,128], index: 0, kind: input, shape index: {}]   ;;  %s660_s1 = inlined_call_operand.vmem [shape: bf16[32,21], index: 1, kind: input, shape index: {}]   ;;  %s661_s2 = inlined_call_operand.vmem [shape: f32[32,1], index: 2, kind: input, shape index: {}]   ;;  %s662_s3 = inlined_call_operand.vmem [shape: bf16[2,32,32], index: 3, kind: input, shape index: {}]   ;;  %s663_s4 = inlined_call_operand.vmem [shape: f32[2,32,1], index: 4, kind: input, shape index: {}]   ;;  %s664_s5 = inlined_call_operand.vmem [shape: bf16[8,32], index: 5, kind: input, shape index: {}]   ;;  %s665_s6 = inlined_call_operand.hbm [shape: f32[8,128], index: 6, kind: output, shape index: {}]  }
   0x1   :  { %v481_v0 = vld [vmem:[%s659_s0] sm:$0xff]   ;;  %v482_v1 = vld [vmem:[%s659_s0 + $0x8] ss:$0 sps:$4 sm:$0x77]   ;;  %v84_v4 = vsel %vm82_vm0, 4294967295, %v537_v3  ;;  %v34_v7 = vld [vmem:[%s661_s2 + $0x10] sm:$0xff] }
   0x2   :  { %442 = vmatprep.subr.bf16.mxu0 %v481_v0  ;;  %v483_v2 = vld [vmem:[%s660_s1] sm:$0xff]   ;;  %v85_v5 = vsel %vm83_vm1, %v84_v4, 0  ;;  %v538_v9 = vmov 0   ;;  %v484_v10 = vld [vmem:[%s660_s1 + $0x8] sm:$0xff]   ;;  %v35_v12 = vld [vmem:[%s661_s2 + $0x18] sm:$0xff] }
   0x3   :  { %443 = vmatpush3.bf16.msra.mxu0 %v481_v0  ;;  %446 = vmatprep.mubr.msk.bf16.mxu0 %vm75_vm2, %v483_v2  ;;  %v32_v6 = vld [vmem:[%s661_s2] sm:$0xff]  ;;  %v87_v8 = vand.u32 %v482_v1, %v85_v5  ;;  %v33_v11 = vld [vmem:[%s661_s2 + $0x8] sm:$0xff] }
   0x4   :  { %479 = vset.pattern.permute.xlu0 %v538_v9  ;;  %480 = vset.pattern.permute.xlu1 %v538_v9  ;;  %v148_v13 = vld [vmem:[%s663_s4] sm:$0xff]  ;;  %v149_v14 = vld [vmem:[%s663_s4 + $0x8] sm:$0xff] }
   0x5   :  { %38 = vperm.xlu0 %479, %v32_v6   ;;  %48 = vperm.xlu1 %480, %v34_v7  }
   0x6   :  { %444 = vmatprep.subr.bf16.mxu0 %v87_v8 }
   0x7   :  { %445 = vmatpush3.bf16.msra.mxu0 %v87_v8 }
   0x9   :  { %43 = vperm.xlu0 %479, %v33_v11   ;;  %53 = vperm.xlu1 %480, %v35_v12  }
   0xa   :  { %447 = vmatmul.mubr.msk.bf16.vlgmr.msra.gmra.mrb[0].mxu0 %vm75_vm2, %v484_v10 }
   0xb   :  { %11 = vsyncpa [#allocation3], 0  ;;  %v150_v15 = vld [vmem:[%s663_s4 + $0x10] sm:$0xff]  ;;  %v151_v16 = vld [vmem:[%s663_s4 + $0x18] sm:$0xff]  ;;  %vm182_vm3 = vcmask 261120   ;;  %v539_v61 = vmov 0.0  }
   0xc   :  { %v418_v17 = vld [vmem:[%s663_s4 + $0x20] sm:$0xff]  ;;  %v419_v18 = vld [vmem:[%s663_s4 + $0x28] sm:$0xff]  ;;  %v420_v19 = vld [vmem:[%s663_s4 + $0x30] sm:$0xff]  ;;  %vm540_vm4 = vmmov 0   ;;  %s541_s9 = smov [#allocation2]  }
   0xd   :  { %154 = vperm.xlu0 %479, %v148_v13   ;;  %159 = vperm.xlu1 %480, %v149_v14   ;;  %v421_v20 = vld [vmem:[%s663_s4 + $0x38] sm:$0xff]  ;;  %v485_v21 = vld [vmem:[%s662_s3] sm:$0xff]   ;;  %v486_v40 = vld [vmem:[%s662_s3 + $0x8] sm:$0xff]   ;;  %s396_s10 = sshll.u32 %s541_s9, 4  ;;  %s397_s10 = int_to_ptr.vmem [resolvable:$true] %s396_s10 }
   0xe   :  { %454 = vmatprep.mubr.msk.bf16.mxu1 %vm182_vm3, %v485_v21  ;;  %v487_v41 = vld [vmem:[%s662_s3 + $0x10] sm:$0xff]   ;;  %v488_v60 = vld [vmem:[%s662_s3 + $0x18] sm:$0xff]   ;;  %s513_s11 = scalar_lea.vmem %s397_s10, 128  ;;  %p518_p1 = scmp.lt.s32.totalorder %s397_s10, %s397_s10 }
   0xf   :  { %462 = vmatprep.mubr.msk.bf16.mxu0 %vm182_vm3, %v487_v41  ;;  %p514_p0 = scmp.ne.s32.totalorder %s397_s10, %s513_s11  ;;  %p519_p2 = scmp.lt.s32.totalorder %s513_s11, %s513_s11 }
  0x11   :  { %164 = vperm.xlu0 %479, %v150_v15   ;;  %169 = vperm.xlu1 %480, %v151_v16   ;;  %v343_v16 = vld [vmem:[%s664_s5] sm:$0xf]  ;;  %p520_p3 = por %p519_p2, %p518_p1 }
  0x13   :  { %p521_p4 = pnand %p520_p3, %p514_p0 }
  0x15   :  { %256 = vperm.xlu0 %479, %v418_v17   ;;  %261 = vperm.xlu1 %480, %v419_v18  }
  0x19   :  { %266 = vperm.xlu0 %479, %v420_v19   ;;  %271 = vperm.xlu1 %480, %v421_v20  }
  0x84   :  { %v49_v22 = vpop.permute.xlu1 %48  ;;  %v39_v23 = vpop.permute.xlu0 %38 }
  0x88   :  { %v54_v27 = vpop.permute.xlu1 %53  ;;  %v44_v30 = vpop.permute.xlu0 %43 }
  0x8c   :  { %v155_v42 = vpop.permute.xlu0 %154  ;;  %v160_v43 = vpop.permute.xlu1 %159 }
  0x90   :  { %v165_v44 = vpop.permute.xlu0 %164  ;;  %v170_v48 = vpop.permute.xlu1 %169 }
  0x94   :  { %v257_v62 = vpop.permute.xlu0 %256  ;;  %v262_v63 = vpop.permute.xlu1 %261 }
  0x98   :  { %v267_v0 = vpop.permute.xlu0 %266  ;;  %v272_v4 = vpop.permute.xlu1 %271 }
  0xdd   :  { %v448_v24 = vpop.f32.mrb[0].mxu0 }
  0xde   :  { %v132_v25 = vadd.f32 %v448_v24, %v49_v22  ;;  %v123_v26 = vpop.f32.mrb[1].mxu0 }
  0xdf   :  { %v124_v28 = vadd.f32 %v123_v26, %v39_v23  ;;  %v449_v29 = vpop.f32.mrb[2].mxu0 }
  0xe0   :  { %489 = vtanh.f32 %v132_v25  ;;  %v135_v31 = vadd.f32 %v449_v29, %v54_v27  ;;  %v126_v32 = vpop.f32.mrb[3].mxu0 }
  0xe1   :  { %491 = vtanh.f32 %v124_v28  ;;  %v127_v33 = vadd.f32 %v126_v32, %v44_v30 }
  0xe2   :  { %493 = vtanh.f32 %v135_v31 }
  0xe3   :  { %495 = vtanh.f32 %v127_v33 }
  0xea   :  { %v490_v34 = vpop.eup %489 }
  0xeb   :  { %v492_v35 = vpop.eup %491 }
  0xec   :  { %v494_v36 = vpop.eup %493 }
  0xed   :  { %v496_v37 = vpop.eup %495  ;;  %v147_v38 = vpack.c.bf16 %v494_v36, %v490_v34 }
  0xee   :  { %v146_v39 = vpack.c.bf16 %v496_v37, %v492_v35 }
  0xf0   :  { %450 = vmatprep.subr.bf16.mxu1 %v146_v39 }
  0xf1   :  { %451 = vmatpush3.bf16.msra.mxu1 %v146_v39 }
  0xf2   :  { %452 = vmatprep.subr.bf16.mxu1 %v147_v38 }
  0xf5   :  { %453 = vmatpush3.bf16.msra.mxu1 %v147_v38 }
  0xf6   :  { %466 = vmatprep.subr.bf16.mxu1 %v539_v61 }
  0xf8   :  { %455 = vmatmul.mubr.msk.bf16.vlgmr.msra.gmra.mrb[0].mxu1 %vm182_vm3, %v486_v40 }
  0xf9   :  { %470 = vmatprep.mubr.msk.bf16.mxu1 %vm540_vm4, %v539_v61 }
 0x1cb   :  { %v456_v45 = vpop.f32.mrb[0].mxu1 }
 0x1cc   :  { %v232_v46 = vadd.f32 %v456_v45, %v165_v44  ;;  %v223_v47 = vpop.f32.mrb[1].mxu1 }
 0x1cd   :  { %v224_v49 = vadd.f32 %v223_v47, %v155_v42  ;;  %v457_v50 = vpop.f32.mrb[2].mxu1 }
 0x1ce   :  { %497 = vtanh.f32 %v232_v46  ;;  %v235_v51 = vadd.f32 %v457_v50, %v170_v48  ;;  %v226_v52 = vpop.f32.mrb[3].mxu1 }
 0x1cf   :  { %499 = vtanh.f32 %v224_v49  ;;  %v227_v53 = vadd.f32 %v226_v52, %v160_v43 }
 0x1d0   :  { %501 = vtanh.f32 %v235_v51 }
 0x1d1   :  { %503 = vtanh.f32 %v227_v53 }
 0x1d8   :  { %v498_v54 = vpop.eup %497 }
 0x1d9   :  { %v500_v55 = vpop.eup %499 }
 0x1da   :  { %v502_v56 = vpop.eup %501 }
 0x1db   :  { %v504_v57 = vpop.eup %503  ;;  %v248_v58 = vpack.c.bf16 %v502_v56, %v498_v54 }
 0x1dc   :  { %v247_v59 = vpack.c.bf16 %v504_v57, %v500_v55 }
 0x1de   :  { %458 = vmatprep.subr.bf16.mxu0 %v247_v59 }
 0x1df   :  { %459 = vmatpush3.bf16.msra.mxu0 %v247_v59 }
 0x1e0   :  { %460 = vmatprep.subr.bf16.mxu0 %v248_v58 }
 0x1e3   :  { %461 = vmatpush3.bf16.msra.mxu0 %v248_v58 }
 0x1e6   :  { %463 = vmatmul.mubr.msk.bf16.vlgmr.msra.gmra.mrb[4].mxu0 %vm182_vm3, %v488_v60 }
 0x2b9   :  { %v464_v1 = vpop.f32.mrb[4].mxu0 }
 0x2ba   :  { %v333_v2 = vadd.f32 %v464_v1, %v267_v0  ;;  %v324_v3 = vpop.f32.mrb[5].mxu0 }
 0x2bb   :  { %v325_v5 = vadd.f32 %v324_v3, %v257_v62  ;;  %v465_v6 = vpop.f32.mrb[6].mxu0 }
 0x2bc   :  { %505 = vtanh.f32 %v333_v2  ;;  %v336_v7 = vadd.f32 %v465_v6, %v272_v4  ;;  %v327_v8 = vpop.f32.mrb[7].mxu0 }
 0x2bd   :  { %507 = vtanh.f32 %v325_v5  ;;  %v328_v9 = vadd.f32 %v327_v8, %v262_v63 }
 0x2be   :  { %509 = vtanh.f32 %v336_v7 }
 0x2bf   :  { %511 = vtanh.f32 %v328_v9 }
 0x2c6   :  { %v506_v10 = vpop.eup %505 }
 0x2c7   :  { %v508_v11 = vpop.eup %507 }
 0x2c8   :  { %v510_v12 = vpop.eup %509 }
 0x2c9   :  { %v512_v13 = vpop.eup %511  ;;  %v345_v14 = vpack.c.bf16 %v510_v12, %v506_v10 }
 0x2ca   :  { %v344_v15 = vpack.c.bf16 %v512_v13, %v508_v11 }
 0x2cc   :  { %467 = vmatpush3.bf16.msra.mxu1 %v344_v15 }
 0x2cd   :  { %468 = vmatprep.subr.bf16.mxu1 %v539_v61 }
 0x2d0   :  { %469 = vmatpush3.bf16.msra.mxu1 %v345_v14 }
 0x2d3   :  { %471 = vmatmul.mubr.msk.bf16.vlgmr.msra.gmra.mrb[4].mxu1 %vm182_vm3, %v343_v16 }
 0x3a6   :  { %v383_v17 = vpop.f32.mrb[4].mxu1 }
 0x3a7   :  { %389 = vst [vmem:[#allocation2] sm:$0xff] %v383_v17  ;;  %v472_v18 = vpop.f32.mrb[5].mxu1 }
 0x3a8   :  { %v386_v19 = vpop.f32.mrb[6].mxu1 }
 0x3a9   :  { %524 = shalt.err (!%p521_p4)
}
 0x3aa   :  { %s525_s5 = scalar_lea.hbm %s665_s6, 128 }
 0x3ab   :  { %p526_p5 = scmp.ne.s32.totalorder %s665_s6, %s525_s5  ;;  %p529_p6 = scmp.lt.u32.totalorder %s525_s5, %s665_s6 }
 0x3ad   :  { %p531_p7 = pnand %p529_p6, %p526_p5 }
 0x3af   :  { %534 = shalt.err (!%p531_p7)
}
 0x3b0   :  { %399 = dma.vmem_to_hbm [thread:$0]  %s397_s10, 128, %s665_s6, [#allocation3]   ;;  %v473_v20 = vpop.f32.mrb[7].mxu1 }
 0x3b1   :  { %535 = dma.done.wait [#allocation3], 128  }
 0x3b2   :  { %536 = vsyncadd [#allocation3], 4294967168 }
 0x3b3   :  { %403 = vsyncpa [#allocation3], 1 }

</bundles_post_ra>
